<compile_context>
chip_gen: v5e
topology: v5e:2x2
jax: 0.10.0
libtpu: 0.0.40
codegen_flags: <defaults>
</compile_context>

<pallas_src>
import numpy as np
import jax
import jax.numpy as jnp
from jax.experimental import pallas as pl
from jax.experimental.pallas import tpu as pltpu

_HIDDEN = 32        # per-network hidden width (matches nn.Linear(., 32))
_OUT_LANES = 128    # lane-dense packed output width
_BIAS_ROWS = 8      # bias rows appended to the f32 weight slab (3 used, 8 for alignment)


def _round_up(n: int, m: int) -> int:
    return (n + m - 1) // m * m


def _cdiv(a: int, b: int) -> int:
    return -(-a // b)


# --------------------------------------------------------------------------
# Kernels: one fused 3-layer MLP over the packed (critic|actor) weight slab.
# --------------------------------------------------------------------------
def _mlp_body(x, w1, w2, w3, b1, b2, b3, out_ref):
    cdt = w1.dtype                       # compute dtype (f32 or bf16)
    x = x.astype(cdt)                    # in-kernel cast: free VPU filler
    # layer 1: [critic_h1 | actor_h1 | zeros]
    h = jnp.dot(x, w1, preferred_element_type=jnp.float32) + b1
    h = jnp.maximum(h, 0.0).astype(cdt)
    # layer 2 (block-diagonal): [critic_h2 | actor_h2 | zeros]
    h = jnp.dot(h, w2, preferred_element_type=jnp.float32) + b2
    h = jnp.maximum(h, 0.0).astype(cdt)
    # layer 3: lane 0 = state value, lanes 1..A = action logits
    out = jnp.dot(h, w3, preferred_element_type=jnp.float32) + b3
    out_ref[...] = out.astype(out_ref.dtype)


def _a2c_kernel_fused_bias(x_ref, w_ref, out_ref):
    """f32 path: weights + biases in one slab -> 2 input DMAs total."""
    f_eff = x_ref.shape[1]                                   # static
    f_slab = w_ref.shape[0] - 2 * _OUT_LANES - _BIAS_ROWS    # 32-aligned
    w1 = w_ref[0:f_eff, :]                                   # contract only F rows
    w2 = w_ref[f_slab:f_slab + _OUT_LANES, :]
    w3 = w_ref[f_slab + _OUT_LANES:f_slab + 2 * _OUT_LANES, :]
    boff = f_slab + 2 * _OUT_LANES
    b1 = w_ref[boff + 0:boff + 1, :]
    b2 = w_ref[boff + 1:boff + 2, :]
    b3 = w_ref[boff + 2:boff + 3, :]
    _mlp_body(x_ref[...], w1, w2, w3, b1, b2, b3, out_ref)


def _a2c_kernel_split_bias(x_ref, w_ref, b_ref, out_ref):
    """bf16-weight path: separate f32 bias slab preserves bias precision."""
    f_eff = x_ref.shape[1]
    f_slab = w_ref.shape[0] - 2 * _OUT_LANES
    w1 = w_ref[0:f_eff, :]
    w2 = w_ref[f_slab:f_slab + _OUT_LANES, :]
    w3 = w_ref[f_slab + _OUT_LANES:f_slab + 2 * _OUT_LANES, :]
    b1 = b_ref[0:1, :]
    b2 = b_ref[1:2, :]
    b3 = b_ref[2:3, :]
    _mlp_body(x_ref[...], w1, w2, w3, b1, b2, b3, out_ref)


# --------------------------------------------------------------------------
# Host-side weight packing (done once, not per forward call).
# --------------------------------------------------------------------------
def default_weight_dtype():
    """bf16 on v5e (bf16-native MXU, halves the slab DMA), f32 elsewhere."""
    try:
        kind = jax.devices()[0].device_kind.lower()
    except Exception:
        return jnp.float32
    if ("v5 lite" in kind) or ("v5e" in kind) or ("v5lite" in kind):
        return jnp.bfloat16
    return jnp.float32


def pack_params(p, n_features: int, n_actions: int, dtype=jnp.float32):
    """Pack critic+actor weights into one weight slab (+ bias slab on bf16)."""
    H, F, A = _HIDDEN, n_features, n_actions
    assert 1 + A <= _OUT_LANES, "n_actions must fit in one 128-lane tile"
    assert 2 * H <= _OUT_LANES

    # Effective feature width the kernel contracts over: pad x only when F is
    # not already sublane-aligned (F=8 -> no pad).  W1 slab block is rounded to
    # 32 rows so W2/W3 slices are tile-aligned for every packed dtype.
    f_eff = F if F % 8 == 0 else _round_up(F, 8)
    f_slab = _round_up(max(f_eff, 1), 32)
    fused_bias = np.dtype(dtype) == np.dtype(jnp.float32)

    w1p = jnp.zeros((f_slab, _OUT_LANES), jnp.float32)
    w1p = w1p.at[:F, 0:H].set(p["cw1"]).at[:F, H:2 * H].set(p["aw1"])

    w2p = jnp.zeros((_OUT_LANES, _OUT_LANES), jnp.float32)
    w2p = w2p.at[0:H, 0:H].set(p["cw2"]).at[H:2 * H, H:2 * H].set(p["aw2"])

    w3p = jnp.zeros((_OUT_LANES, _OUT_LANES), jnp.float32)
    w3p = w3p.at[0:H, 0:1].set(p["cw3"]).at[H:2 * H, 1:1 + A].set(p["aw3"])

    b_slab = jnp.zeros((3, _OUT_LANES), jnp.float32)
    b_slab = b_slab.at[0, 0:H].set(p["cb1"][0]).at[0, H:2 * H].set(p["ab1"][0])
    b_slab = b_slab.at[1, 0:H].set(p["cb2"][0]).at[1, H:2 * H].set(p["ab2"][0])
    b_slab = b_slab.at[2, 0:1].set(p["cb3"][0]).at[2, 1:1 + A].set(p["ab3"][0])

    if fused_bias:
        b_rows = jnp.zeros((_BIAS_ROWS, _OUT_LANES), jnp.float32)
        b_rows = b_rows.at[0:3, :].set(b_slab)
        w_slab = jnp.concatenate([w1p, w2p, w3p, b_rows], axis=0).astype(dtype)
        b_out = None
    else:
        w_slab = jnp.concatenate([w1p, w2p, w3p], axis=0).astype(dtype)
        b_out = b_slab                      # f32 biases kept separate

    return {"w": w_slab, "b": b_out, "f_eff": f_eff,
            "n_features": F, "n_actions": A, "fused_bias": fused_bias}


# --------------------------------------------------------------------------
# Wrapper (everything, including the output slices, lives inside one jit).
# --------------------------------------------------------------------------
def _choose_tm(n_rows: int, block_m: int) -> int:
    if n_rows <= 8:
        return max(n_rows, 1)                       # single full-dim block
    tm = min(block_m, (n_rows // 8) * 8)
    # v7x has 2 TensorCores: give the "parallel" batch axis >= 2 grid steps
    # once there is enough work to split (no effect on v5e/v6e single-TC).
    if n_rows >= 256:
        tm = min(tm, _round_up(_cdiv(n_rows, 2), 8))
    return max(tm, 8)


def make_a2c_forward(packed, *, block_m: int = 2048, out_dtype=jnp.float32,
                     return_packed: bool = False):
    """Returns a jitted fn(x[n_envs, F]) -> (values [n_envs,1], logits [n_envs,A]).

    Set out_dtype=jnp.bfloat16 for very large batches if downstream RL code
    tolerates bf16 (halves HBM writeback); set return_packed=True to skip the
    slices and get the raw [n_envs, 128] slab.
    """
    F = packed["n_features"]
    F_eff = packed["f_eff"]
    A = packed["n_actions"]
    w_slab = packed["w"]
    b_slab = packed["b"]          # None on the fused-bias (f32) path

    def fwd(x, w, b):
        n_envs = x.shape[0]
        assert x.shape[1] == F, "feature dim mismatch"
        if F_eff != F:            # only when F is not a multiple of 8
            x = jnp.pad(x, ((0, 0), (0, F_eff - F)))

        tm = _choose_tm(n_envs, block_m)
        grid = (_cdiv(n_envs, tm),)     # ragged last block: OOB rows discarded

        in_specs = [pl.BlockSpec((tm, F_eff), lambda i: (i, 0)),
                    pl.BlockSpec(w.shape, lambda i: (0, 0))]   # weights resident
        args = [x, w]
        kernel = _a2c_kernel_fused_bias
        if b is not None:
            in_specs.append(pl.BlockSpec(b.shape, lambda i: (0, 0)))
            args.append(b)
            kernel = _a2c_kernel_split_bias

        out = pl.pallas_call(
            kernel,
            out_shape=jax.ShapeDtypeStruct((n_envs, _OUT_LANES), out_dtype),
            grid_spec=pltpu.PrefetchScalarGridSpec(
                num_scalar_prefetch=0,
                grid=grid,
                in_specs=in_specs,
                out_specs=pl.BlockSpec((tm, _OUT_LANES), lambda i: (i, 0)),
            ),
            compiler_params=pltpu.CompilerParams(
                dimension_semantics=("parallel",)),
        )(*args)

        if return_packed:
            return out
        values = out[:, 0:1]            # fused with the kernel inside this jit
        logits = out[:, 1:1 + A]
        return values, logits

    fwd = jax.jit(fwd)

    def call(x):
        return fwd(x, w_slab, b_slab)

    return call


# --------------------------------------------------------------------------
# PyTorch-style init (weights stored [in, out] so the kernel does x @ W + b,
# equivalent to PyTorch's x @ W.T + b).
# --------------------------------------------------------------------------
def init_params(key, n_features, n_actions, hidden=_HIDDEN):
    def linear(key, fan_in, fan_out):
        kw, kb = jax.random.split(key)
        bound = 1.0 / jnp.sqrt(jnp.float32(fan_in))
        w = jax.random.uniform(kw, (fan_in, fan_out), jnp.float32, -bound, bound)
        b = jax.random.uniform(kb, (1, fan_out), jnp.float32, -bound, bound)
        return w, b

    keys = jax.random.split(key, 6)
    cw1, cb1 = linear(keys[0], n_features, hidden)
    cw2, cb2 = linear(keys[1], hidden, hidden)
    cw3, cb3 = linear(keys[2], hidden, 1)
    aw1, ab1 = linear(keys[3], n_features, hidden)
    aw2, ab2 = linear(keys[4], hidden, hidden)
    aw3, ab3 = linear(keys[5], hidden, n_actions)
    return dict(cw1=cw1, cb1=cb1, cw2=cw2, cb2=cb2, cw3=cw3, cb3=cb3,
                aw1=aw1, ab1=ab1, aw2=aw2, ab2=ab2, aw3=aw3, ab3=ab3)


def _reference(x, p):
    """Pure-JAX reference (unfused, f32) for validation."""
    h = jnp.maximum(x @ p["cw1"] + p["cb1"], 0.0)
    h = jnp.maximum(h @ p["cw2"] + p["cb2"], 0.0)
    v = h @ p["cw3"] + p["cb3"]
    g = jnp.maximum(x @ p["aw1"] + p["ab1"], 0.0)
    g = jnp.maximum(g @ p["aw2"] + p["ab2"], 0.0)
    logits = g @ p["aw3"] + p["ab3"]
    return v, logits


# TODO(synk): select_action (categorical sampling / log-prob / entropy), GAE
# losses (get_losses) and the RMSprop optimizer updates are training-loop logic
# outside this forward pass and are not translated to Pallas.

if __name__ == "__main__":
    n_envs = 8        # batch of parallel environments
    n_features = 8    # state feature dim
    n_actions = 4

    key = jax.random.PRNGKey(0)
    k_params, k_x, k_xl = jax.random.split(key, 3)
    params = init_params(k_params, n_features, n_actions)
    x = jax.random.normal(k_x, (n_envs, n_features), jnp.float32)

    v_ref, l_ref = _reference(x, params)

    # --- f32 path (fused-bias slab, 2 input DMAs; tight check) ---
    packed_f32 = pack_params(params, n_features, n_actions, dtype=jnp.float32)
    fwd_f32 = make_a2c_forward(packed_f32)
    values, logits = jax.block_until_ready(fwd_f32(x))

    assert values.shape == (n_envs, 1)
    assert logits.shape == (n_envs, n_actions)
    assert jnp.allclose(values, v_ref, atol=1e-4, rtol=1e-4)
    assert jnp.allclose(logits, l_ref, atol=1e-4, rtol=1e-4)

    # --- bf16 weight/activation path (v5e-recommended), f32 accumulation ---
    packed_bf16 = pack_params(params, n_features, n_actions, dtype=jnp.bfloat16)
    fwd_bf16 = make_a2c_forward(packed_bf16)
    v16, l16 = jax.block_until_ready(fwd_bf16(x))
    assert jnp.allclose(v16, v_ref, atol=5e-2, rtol=5e-2)
    assert jnp.allclose(l16, l_ref, atol=5e-2, rtol=5e-2)

    # --- larger batch: exercises the >=2-step "parallel" grid (v7x megacore)
    #     and the ragged last block (no wrapper-side batch pad). ---
    n_large = 300
    xl = jax.random.normal(k_xl, (n_large, n_features), jnp.float32)
    vl_ref, ll_ref = _reference(xl, params)
    vl, ll = jax.block_until_ready(fwd_f32(xl))
    assert vl.shape == (n_large, 1) and ll.shape == (n_large, n_actions)
    assert jnp.allclose(vl, vl_ref, atol=1e-4, rtol=1e-4)
    assert jnp.allclose(ll, ll_ref, atol=1e-4, rtol=1e-4)

    print("KERNEL_OK")
</pallas_src>

<mosaic_0001>
module attributes {stable_mosaic.version = 11 : i64} {
  func.func @_a2c_kernel_fused_bias(%arg0: i32, %arg1: memref<8x8xf32, #tpu.memory_space<vmem>>, %arg2: memref<296x128xf32, #tpu.memory_space<vmem>>, %arg3: memref<8x128xf32, #tpu.memory_space<vmem>>) attributes {dimension_semantics = [#tpu.dimension_semantics<parallel>], iteration_bounds = array<i64: 1>, scalar_prefetch = 0 : i64, scratch_operands = 0 : i64, tpu.core_type = #tpu.core_type<tc>, window_params = [{transform_indices = @transform_0, window_bounds = array<i64: 8, 8>}, {pipeline_mode = #tpu.pipeline_mode<synchronous>, transform_indices = @transform_1, window_bounds = array<i64: 296, 128>}, {transform_indices = @transform_2, window_bounds = array<i64: 8, 128>}]} {
    %c0 = arith.constant 0 : index
    %c0_0 = arith.constant 0 : index
    %0 = vector.load %arg2[%c0, %c0_0] : memref<296x128xf32, #tpu.memory_space<vmem>>, vector<8x128xf32>
    %c32 = arith.constant 32 : index
    %c0_1 = arith.constant 0 : index
    %1 = vector.load %arg2[%c32, %c0_1] : memref<296x128xf32, #tpu.memory_space<vmem>>, vector<128x128xf32>
    %c160 = arith.constant 160 : index
    %c0_2 = arith.constant 0 : index
    %2 = vector.load %arg2[%c160, %c0_2] : memref<296x128xf32, #tpu.memory_space<vmem>>, vector<128x128xf32>
    %c288 = arith.constant 288 : index
    %c0_3 = arith.constant 0 : index
    %3 = vector.load %arg2[%c288, %c0_3] : memref<296x128xf32, #tpu.memory_space<vmem>>, vector<1x128xf32>
    %c289 = arith.constant 289 : index
    %c0_4 = arith.constant 0 : index
    %4 = vector.load %arg2[%c289, %c0_4] : memref<296x128xf32, #tpu.memory_space<vmem>>, vector<1x128xf32>
    %c290 = arith.constant 290 : index
    %c0_5 = arith.constant 0 : index
    %5 = vector.load %arg2[%c290, %c0_5] : memref<296x128xf32, #tpu.memory_space<vmem>>, vector<1x128xf32>
    %c0_6 = arith.constant 0 : index
    %c0_7 = arith.constant 0 : index
    %6 = vector.load %arg1[%c0_6, %c0_7] : memref<8x8xf32, #tpu.memory_space<vmem>>, vector<8x8xf32>
    %cst = arith.constant dense<0.000000e+00> : vector<8x128xf32>
    %7 = tpu.matmul %6, %0, %cst {dimension_numbers = #tpu.dot_dimension_numbers<[1], [0], [0], [1], [0, 0, 1, 1], [], []>} : vector<8x8xf32>, vector<8x128xf32>, vector<8x128xf32> -> vector<8x128xf32>
    %8 = vector.broadcast %3 : vector<1x128xf32> to vector<8x128xf32>
    %9 = arith.addf %7, %8 : vector<8x128xf32>
    %cst_8 = arith.constant 0.000000e+00 : f32
    %10 = vector.broadcast %cst_8 : f32 to vector<8x128xf32>
    %11 = arith.maximumf %9, %10 : vector<8x128xf32>
    %cst_9 = arith.constant dense<0.000000e+00> : vector<8x128xf32>
    %12 = tpu.matmul %11, %1, %cst_9 {dimension_numbers = #tpu.dot_dimension_numbers<[1], [0], [0], [1], [0, 0, 1, 1], [], []>} : vector<8x128xf32>, vector<128x128xf32>, vector<8x128xf32> -> vector<8x128xf32>
    %13 = vector.broadcast %4 : vector<1x128xf32> to vector<8x128xf32>
    %14 = arith.addf %12, %13 : vector<8x128xf32>
    %cst_10 = arith.constant 0.000000e+00 : f32
    %15 = vector.broadcast %cst_10 : f32 to vector<8x128xf32>
    %16 = arith.maximumf %14, %15 : vector<8x128xf32>
    %cst_11 = arith.constant dense<0.000000e+00> : vector<8x128xf32>
    %17 = tpu.matmul %16, %2, %cst_11 {dimension_numbers = #tpu.dot_dimension_numbers<[1], [0], [0], [1], [0, 0, 1, 1], [], []>} : vector<8x128xf32>, vector<128x128xf32>, vector<8x128xf32> -> vector<8x128xf32>
    %18 = vector.broadcast %5 : vector<1x128xf32> to vector<8x128xf32>
    %19 = arith.addf %17, %18 : vector<8x128xf32>
    %c0_12 = arith.constant 0 : index
    %c0_13 = arith.constant 0 : index
    %20 = vector.load %arg3[%c0_12, %c0_13] : memref<8x128xf32, #tpu.memory_space<vmem>>, vector<8x128xf32>
    tpu.vector_store %arg3[%c0_12, %c0_13], %19 {strides = array<i32>} : memref<8x128xf32, #tpu.memory_space<vmem>>, vector<8x128xf32>,
    return
  }
  func.func @transform_0(%arg0: i32) -> (i32, i32) {
    %c0_i32 = arith.constant 0 : i32
    %c0_i32_0 = arith.constant 0 : i32
    return %arg0, %c0_i32 : i32, i32
  }
  func.func @transform_1(%arg0: i32) -> (i32, i32) {
    %c0_i32 = arith.constant 0 : i32
    %c0_i32_0 = arith.constant 0 : i32
    %c0_i32_1 = arith.constant 0 : i32
    return %c0_i32, %c0_i32_0 : i32, i32
  }
  func.func @transform_2(%arg0: i32) -> (i32, i32) {
    %c0_i32 = arith.constant 0 : i32
    %c0_i32_0 = arith.constant 0 : i32
    return %arg0, %c0_i32 : i32, i32
  }
}

</mosaic_0001>

<bundles_post_ra>
// kernel: fwd.1
= control target key start
LH: loop header
LB: loop body
LE: loop exit
PB: predicated region body
PF: predicated region fallthrough
CT: control target
= control target key end

     0   :  { %7 = vsyncpa [#allocation3], 0  ;;  %s242_s0 = inlined_call_operand.hbm [shape: f32[8,8], index: 0, kind: input, shape index: {}]   ;;  %s243_s1 = inlined_call_operand.hbm [shape: f32[296,128], index: 1, kind: input, shape index: {}]   ;;  %s244_s2 = inlined_call_operand.vmem [shape: f32[8,128], index: 2, kind: output, shape index: {}]  }
   0x1   :  { %s14_s11 = sshll.u32 %s242_s0, 4  ;;  %s15_s11 = int_to_ptr.hbm [resolvable:$true] %s14_s11 }
   0x2   :  { %8 = vsyncpa [#allocation5], 0  ;;  %s214_s12 = smov [#allocation2]   ;;  %s24_s16 = sshll.u32 %s243_s1, 4  ;;  %s25_s16 = int_to_ptr.hbm [resolvable:$true] %s24_s16 }
   0x3   :  { %s16_s13 = sshll.u32 %s214_s12, 4  ;;  %s215_s17 = smov [#allocation4]   ;;  %s17_s13 = int_to_ptr.vmem [resolvable:$true] %s16_s13 }
   0x4   :  { %19 = dma.hbm_to_vmem [thread:$0]  %s15_s11, 128, %s17_s13, [#allocation3]  }
   0x5   :  { %s26_s18 = sshll.u32 %s215_s17, 4  ;;  %s216_s19 = smov 128   ;;  %s27_s18 = int_to_ptr.vmem [resolvable:$true] %s26_s18 }
   0x6   :  { %s217_s20 = smov 8  }
   0x7   :  { %32 = dma.hbm_to_vmem [thread:$0]  %s25_s16, 4736, %s27_s18, [#allocation5], %s216_s19, %s216_s19, %s217_s20  }
   0x8   :  { %210 = dma.done.wait [#allocation3], 128  }
   0x9   :  { %211 = vsyncadd [#allocation3], 4294967168 }
   0xa   :  { %212 = dma.done.wait [#allocation5], 4736  }
   0xb   :  { %213 = vsyncadd [#allocation5], 4294962560  ;;  %vm79_vm0 = vcmask 64512   ;;  %v41_v0 = vld [vmem:[#allocation4] sm:$0xff]  ;;  %v77_v1 = vld [vmem:[#allocation2] sm:$0xff] }
   0xc   :  { %v57_v2 = vld [vmem:[#allocation4 + $0x98] sm:$0xff]  ;;  %98 = vmatpush.msra.mxu0 %v41_v0  ;;  %v56_v3 = vld [vmem:[#allocation4 + $0x90] sm:$0xff]  ;;  %v55_v4 = vld [vmem:[#allocation4 + $0x88] sm:$0xff] }
   0xd   :  { %105 = vmatpush.msra.mxu1 %v57_v2  ;;  %154 = vmatmul.msk.f32.vlgmr.msra.gmra.mxu0 %vm79_vm0, %v77_v1  ;;  %v54_v5 = vld [vmem:[#allocation4 + $0x80] sm:$0xff]  ;;  %v53_v6 = vld [vmem:[#allocation4 + $0x78] sm:$0xff]  ;;  %v52_v7 = vld [vmem:[#allocation4 + $0x70] sm:$0xff] }
   0xe   :  { %v51_v8 = vld [vmem:[#allocation4 + $0x68] sm:$0xff]  ;;  %v50_v9 = vld [vmem:[#allocation4 + $0x60] sm:$0xff]  ;;  %v49_v10 = vld [vmem:[#allocation4 + $0x58] sm:$0xff] }
   0xf   :  { %106 = vmatpush.msra.mxu1 %v56_v3  ;;  %v48_v11 = vld [vmem:[#allocation4 + $0x50] sm:$0xff]  ;;  %v47_v12 = vld [vmem:[#allocation4 + $0x48] sm:$0xff]  ;;  %v46_v13 = vld [vmem:[#allocation4 + $0x40] sm:$0xff] }
  0x10   :  { %v45_v14 = vld [vmem:[#allocation4 + $0x38] sm:$0xff]  ;;  %v44_v15 = vld [vmem:[#allocation4 + $0x30] sm:$0xff]  ;;  %v43_v16 = vld [vmem:[#allocation4 + $0x28] sm:$0xff] }
  0x11   :  { %107 = vmatpush.msra.mxu1 %v55_v4  ;;  %v42_v17 = vld [vmem:[#allocation4 + $0x20] sm:$0xff]  ;;  %v73_v18 = vld [vmem:[#allocation4 + $0x118] sm:$0xff]  ;;  %v72_v19 = vld [vmem:[#allocation4 + $0x110] sm:$0xff] }
  0x12   :  { %127 = vmatpush.msra.mxu2 %v73_v18  ;;  %v71_v20 = vld [vmem:[#allocation4 + $0x108] sm:$0xff]  ;;  %v70_v21 = vld [vmem:[#allocation4 + $0x100] sm:$0xff]  ;;  %v69_v22 = vld [vmem:[#allocation4 + $0xf8] sm:$0xff] }
  0x13   :  { %108 = vmatpush.msra.mxu1 %v54_v5  ;;  %v68_v23 = vld [vmem:[#allocation4 + $0xf0] sm:$0xff]  ;;  %v67_v24 = vld [vmem:[#allocation4 + $0xe8] sm:$0xff]  ;;  %v66_v25 = vld [vmem:[#allocation4 + $0xe0] sm:$0xff] }
  0x14   :  { %128 = vmatpush.msra.mxu2 %v72_v19  ;;  %v65_v26 = vld [vmem:[#allocation4 + $0xd8] sm:$0xff]  ;;  %v64_v27 = vld [vmem:[#allocation4 + $0xd0] sm:$0xff]  ;;  %v63_v28 = vld [vmem:[#allocation4 + $0xc8] sm:$0xff] }
  0x15   :  { %109 = vmatpush.msra.mxu1 %v53_v6  ;;  %v62_v29 = vld [vmem:[#allocation4 + $0xc0] sm:$0xff]  ;;  %v61_v30 = vld [vmem:[#allocation4 + $0xb8] sm:$0xff]  ;;  %v60_v35 = vld [vmem:[#allocation4 + $0xb0] sm:$0xff] }
  0x16   :  { %129 = vmatpush.msra.mxu2 %v71_v20  ;;  %v159_v31 = vld [vmem:[#allocation4 + $0x120] ss:$0 sm:$0xff]  ;;  %v59_v36 = vld [vmem:[#allocation4 + $0xa8] sm:$0xff]  ;;  %v160_v38 = vld [vmem:[#allocation4 + $0x121] ss:$0 sm:$0xff] }
  0x17   :  { %110 = vmatpush.msra.mxu1 %v52_v7  ;;  %v58_v37 = vld [vmem:[#allocation4 + $0xa0] sm:$0xff] }
  0x18   :  { %130 = vmatpush.msra.mxu2 %v70_v21  ;;  %v161_v42 = vld [vmem:[#allocation4 + $0x122] ss:$0 sm:$0xff] }
  0x19   :  { %111 = vmatpush.msra.mxu1 %v51_v8 }
  0x1a   :  { %131 = vmatpush.msra.mxu2 %v69_v22 }
  0x1b   :  { %112 = vmatpush.msra.mxu1 %v50_v9 }
  0x1c   :  { %132 = vmatpush.msra.mxu2 %v68_v23 }
  0x1d   :  { %113 = vmatpush.msra.mxu1 %v49_v10 }
  0x1e   :  { %133 = vmatpush.msra.mxu2 %v67_v24 }
  0x1f   :  { %114 = vmatpush.msra.mxu1 %v48_v11 }
  0x20   :  { %134 = vmatpush.msra.mxu2 %v66_v25 }
  0x21   :  { %115 = vmatpush.msra.mxu1 %v47_v12 }
  0x22   :  { %135 = vmatpush.msra.mxu2 %v65_v26 }
  0x23   :  { %116 = vmatpush.msra.mxu1 %v46_v13 }
  0x24   :  { %136 = vmatpush.msra.mxu2 %v64_v27 }
  0x25   :  { %117 = vmatpush.msra.mxu1 %v45_v14 }
  0x26   :  { %137 = vmatpush.msra.mxu2 %v63_v28 }
  0x27   :  { %118 = vmatpush.msra.mxu1 %v44_v15 }
  0x28   :  { %138 = vmatpush.msra.mxu2 %v62_v29 }
  0x29   :  { %119 = vmatpush.msra.mxu1 %v43_v16 }
  0x2a   :  { %139 = vmatpush.msra.mxu2 %v61_v30 }
  0x2b   :  { %120 = vmatpush.msra.mxu1 %v42_v17 }
  0x2c   :  { %140 = vmatpush.msra.mxu2 %v60_v35 }
  0x2e   :  { %141 = vmatpush.msra.mxu2 %v59_v36 }
  0x30   :  { %142 = vmatpush.msra.mxu2 %v58_v37 }
  0x8a   :  { %v100_v32 = vpop.f32.mrf.mxu0 }
  0x8b   :  { %v101_v33 = vadd.f32 %v159_v31, %v100_v32 }
  0x8d   :  { %v103_v34 = vmax.f32 %v101_v33, 0.0 }
  0x8f   :  { %121 = vmatmul.f32.vlgmr.msra.gmra.mxu1 %v103_v34 }
 0x10c   :  { %v122_v39 = vpop.f32.mrf.mxu1 }
 0x10d   :  { %v123_v40 = vadd.f32 %v160_v38, %v122_v39 }
 0x10f   :  { %v125_v41 = vmax.f32 %v123_v40, 0.0 }
 0x111   :  { %143 = vmatmul.f32.vlgmr.msra.gmra.mxu2 %v125_v41 }
 0x194   :  { %v144_v43 = vpop.f32.mrf.mxu2 }
 0x195   :  { %v145_v44 = vadd.f32 %v161_v42, %v144_v43 }
 0x197   :  { %147 = vst [vmem:[%s244_s2] sm:$0xff] %v145_v44 }
 0x198   :  { %152 = vsyncpa [#allocation3], 1 }
 0x199   :  { %153 = vsyncpa [#allocation5], 1 }

</bundles_post_ra>
